<compile_context>
chip_gen: v5e
topology: v5e:2x2
jax: 0.10.0
libtpu: 0.0.40
codegen_flags: <defaults>
</compile_context>

<pallas_src>
import functools

import jax
import jax.numpy as jnp
import numpy as np
from jax.experimental import pallas as pl
from jax.experimental.pallas import tpu as pltpu


# Below this size a plain XLA copy beats a kernel launch for the materialized path.
_SMALL_FAST_PATH_BYTES = 256 * 1024
# Never split a DMA below this size; keeps per-DMA descriptor setup negligible.
_MIN_CHUNK_BYTES = 512 * 1024
# Cap on concurrent DMAs (also the max leading-axis divisor searched).
_MAX_CHUNKS = 8


def _dma_copy_kernel(x_hbm, o_hbm, sems, *, n_chunks, chunk):
    """Pure HBM->HBM copy: no VMEM staging, just the DMA engine at HBM bandwidth."""
    if n_chunks == 1:
        cp = pltpu.make_async_copy(x_hbm, o_hbm, sems.at[0])
        cp.start()
        cp.wait()
    else:
        # Start every chunk first (multiple DMAs in flight), then wait on all.
        for c in range(n_chunks):
            pltpu.make_async_copy(
                x_hbm.at[pl.ds(c * chunk, chunk)],
                o_hbm.at[pl.ds(c * chunk, chunk)],
                sems.at[c],
            ).start()
        for c in range(n_chunks):
            pltpu.make_async_copy(
                x_hbm.at[pl.ds(c * chunk, chunk)],
                o_hbm.at[pl.ds(c * chunk, chunk)],
                sems.at[c],
            ).wait()


def _pallas_identity_copy(x: jax.Array) -> jax.Array:
    """Materialized identity: direct HBM->HBM DMA copy kernel."""
    total = int(x.size)
    if total == 0:
        return x
    itemsize = jnp.dtype(x.dtype).itemsize
    nbytes = total * itemsize

    # Split the leading axis into a few equal chunks so several DMAs stream
    # concurrently; fall back to one whole-array DMA for small or odd shapes.
    leading = int(x.shape[0]) if x.ndim >= 1 else 1
    n_chunks = 1
    for cand in (8, 4, 2):
        if cand <= _MAX_CHUNKS and leading % cand == 0 and nbytes // cand >= _MIN_CHUNK_BYTES:
            n_chunks = cand
            break
    chunk = (leading // n_chunks) if x.ndim >= 1 else 1

    kernel = functools.partial(_dma_copy_kernel, n_chunks=n_chunks, chunk=chunk)

    return pl.pallas_call(
        kernel,
        out_shape=jax.ShapeDtypeStruct(x.shape, x.dtype),
        in_specs=[pl.BlockSpec(memory_space=pl.ANY)],   # raw HBM ref, no auto-DMA
        out_specs=pl.BlockSpec(memory_space=pl.ANY),    # raw HBM ref, written via DMA
        scratch_shapes=[pltpu.SemaphoreType.DMA((n_chunks,))],
        cost_estimate=pl.CostEstimate(
            flops=0, transcendentals=0, bytes_accessed=2 * nbytes),
    )(x)


def nothing_forward(x: jax.Array, materialize: bool = False,
                    force_kernel: bool = False) -> jax.Array:
    """Forward of `Nothing` (identity).

    Default path returns `x` as-is — zero compute, zero HBM traffic (the right
    "optimization" for an identity module).  `materialize=True` produces a
    distinct output buffer via a direct HBM->HBM DMA Pallas kernel; tiny
    inputs take a plain XLA copy unless `force_kernel=True`.
    """
    if not materialize:
        return x
    nbytes = int(x.size) * jnp.dtype(x.dtype).itemsize
    if not force_kernel and nbytes <= _SMALL_FAST_PATH_BYTES:
        return jnp.copy(x)   # small-tensor fast path: launch overhead dominates
    return _pallas_identity_copy(x)


if __name__ == "__main__":
    key = jax.random.PRNGKey(0)
    k1, k2 = jax.random.split(key)

    # Primary test: small NCHW feature map (batch=2, channels=4, 16x16).
    x = jax.random.normal(k1, (2, 4, 16, 16), dtype=jnp.float32)
    x_host = np.asarray(jax.device_get(x))

    y_id = jax.block_until_ready(nothing_forward(x))                      # identity path
    y_fast = jax.block_until_ready(nothing_forward(x, materialize=True))  # small fast path
    y_kern = jax.block_until_ready(                                       # Pallas DMA kernel
        nothing_forward(x, materialize=True, force_kernel=True))

    assert y_kern.shape == x_host.shape and y_kern.dtype == jnp.float32
    assert np.array_equal(np.asarray(jax.device_get(y_id)), x_host)
    assert np.array_equal(np.asarray(jax.device_get(y_fast)), x_host)
    assert np.array_equal(np.asarray(jax.device_get(y_kern)), x_host)

    # Second test: 1 MiB input exercises the multi-chunk (concurrent-DMA) branch.
    x2 = jax.random.normal(k2, (8, 256, 128), dtype=jnp.float32)
    x2_host = np.asarray(jax.device_get(x2))
    y2 = jax.block_until_ready(nothing_forward(x2, materialize=True))
    assert np.array_equal(np.asarray(jax.device_get(y2)), x2_host)

    print("KERNEL_OK")
</pallas_src>

<mosaic_0001>
module attributes {stable_mosaic.version = 11 : i64} {
  func.func @_dma_copy_kernel(%arg0: memref<2x4x16x16xf32, #tpu.memory_space<any>>, %arg1: memref<2x4x16x16xf32, #tpu.memory_space<any>>, %arg2: memref<1x!tpu.dma_semaphore, #tpu.memory_space<semaphore_mem>>) attributes {dimension_semantics = [], scalar_prefetch = 0 : i64, scratch_operands = 1 : i64, tpu.core_type = #tpu.core_type<tc>} {
    %c0_i32 = arith.constant 0 : i32
    %0 = tpu.memref_slice %arg2[%c0_i32] : memref<1x!tpu.dma_semaphore, #tpu.memory_space<semaphore_mem>> -> memref<1x!tpu.dma_semaphore, #tpu.memory_space<semaphore_mem>>
    %1 = tpu.memref_squeeze %0 : memref<1x!tpu.dma_semaphore, #tpu.memory_space<semaphore_mem>> -> memref<!tpu.dma_semaphore, #tpu.memory_space<semaphore_mem>>
    tpu.enqueue_dma source(%arg0 : memref<2x4x16x16xf32, #tpu.memory_space<any>>) target(%arg1 : memref<2x4x16x16xf32, #tpu.memory_space<any>>) target_semaphore(%1 : memref<!tpu.dma_semaphore, #tpu.memory_space<semaphore_mem>>)
    %c0_i32_0 = arith.constant 0 : i32
    %2 = tpu.memref_slice %arg2[%c0_i32_0] : memref<1x!tpu.dma_semaphore, #tpu.memory_space<semaphore_mem>> -> memref<1x!tpu.dma_semaphore, #tpu.memory_space<semaphore_mem>>
    %3 = tpu.memref_squeeze %2 : memref<1x!tpu.dma_semaphore, #tpu.memory_space<semaphore_mem>> -> memref<!tpu.dma_semaphore, #tpu.memory_space<semaphore_mem>>
    tpu.wait_dma2 semaphore(%3 : memref<!tpu.dma_semaphore, #tpu.memory_space<semaphore_mem>>) src(%arg0 : memref<2x4x16x16xf32, #tpu.memory_space<any>>) dst(%arg1 : memref<2x4x16x16xf32, #tpu.memory_space<any>>)
    return
  }
}

</mosaic_0001>

<bundles_post_ra>
// kernel: tpu_custom_call.1
= control target key start
LH: loop header
LB: loop body
LE: loop exit
PB: predicated region body
PF: predicated region fallthrough
CT: control target
= control target key end

     0   :  { %s34_s12 = smov [#allocation2]   ;;  %s35_s13 = smov [#allocation3]   ;;  %s53_s0 = inlined_call_operand.hbm [shape: f32[2,4,16,16], index: 0, kind: input, shape index: {}]   ;;  %s54_s1 = inlined_call_operand.hbm [shape: f32[2,4,16,16], index: 1, kind: output, shape index: {}]  }
   0x1   :  { %s10_s8 = sshll.u32 %s53_s0, 4  ;;  %s12_s11 = sshll.u32 %s54_s1, 4  ;;  %s11_s8 = int_to_ptr.hbm [resolvable:$true] %s10_s8  ;;  %s13_s11 = int_to_ptr.hbm [resolvable:$true] %s12_s11 }
   0x2   :  { %s36_s14 = smov 0  }
   0x3   :  { %16 = dma.general %s11_s8, 2048, %s13_s11, %s34_s12, %s35_s13, [#allocation4], %s36_s14, 0  }
   0x4   :  { %32 = dma.done.wait [#allocation2], 2048 }
   0x5   :  { %33 = vsyncadd [#allocation2], 4294965248 }
   0x6   :  { %22 = vsyncmov [#allocation2] }
   0x9   :  { %s23_s15 = vpop.sfrf %22 }
   0xa   :  { %p28_p0 = scmp.ne.s32.totalorder %s23_s15, 0 }
   0xc   :  { %27 = shalt.err (%p28_p0)  }

</bundles_post_ra>
